<compile_context>
chip_gen: v7x
topology: tpu7x:2x2x1
jax: 0.10.0
libtpu: 0.0.40
codegen_flags: <defaults>
</compile_context>

<pallas_src>
import functools

import jax
import jax.numpy as jnp
from jax.experimental import pallas as pl
from jax.experimental.pallas import tpu as pltpu

MARGIN = 2.0
EPS = 1e-6  # F.pairwise_distance default eps (added to the difference)


def _round_up(x, m):
    return ((x + m - 1) // m) * m


def _choose_batch_tile(batch, feat, itemsize):
    # ~2 MiB per input tile => 3 inputs * 2 (double buffer) ~= 12 MiB, which
    # fits the 16 MiB (v5e) / 32 MiB (v6e, v7x) scoped-VMEM defaults with room
    # to spare, so no vmem_limit_bytes override is needed on any generation.
    rows = (2 * 1024 * 1024) // max(feat * itemsize, 1)
    rows = max(8, min(2048, rows))
    rows = min(rows, _round_up(batch, 8))
    return _round_up(rows, 8)


def _triplet_loss_kernel(o1_ref, o2_ref, o3_ref, loss_ref, acc_ref,
                         *, batch, margin, eps):
    i = pl.program_id(0)

    @pl.when(i == 0)
    def _init():
        acc_ref[...] = jnp.zeros_like(acc_ref)

    o1 = o1_ref[...].astype(jnp.float32)
    o2 = o2_ref[...].astype(jnp.float32)
    o3 = o3_ref[...].astype(jnp.float32)

    # F.pairwise_distance(x, y) = || x - y + eps ||_2 along the last dim.
    diff_p = o1 - o2 + eps
    diff_n = o1 - o3 + eps
    d_p = jnp.sqrt(jnp.sum(diff_p * diff_p, axis=-1, keepdims=True))  # (TB, 1)
    d_n = jnp.sqrt(jnp.sum(diff_n * diff_n, axis=-1, keepdims=True))  # (TB, 1)

    hinge = jnp.maximum(margin - d_n + d_p, 0.0)                      # (TB, 1)

    # Mask rows of a ragged last tile (rows >= true batch contribute 0).
    tb = hinge.shape[0]
    row = jax.lax.broadcasted_iota(jnp.int32, (tb, 1), 0) + i * tb
    hinge = jnp.where(row < batch, hinge, 0.0)

    # Defer the cross-sublane collapse: accumulate per-row partial sums.
    acc_ref[...] += hinge

    @pl.when(i == pl.num_programs(0) - 1)
    def _finalize():
        # Divide by the TRUE batch size, not the (possibly padded) tile count.
        loss_ref[0, 0] = jnp.sum(acc_ref[...]) / jnp.float32(batch)


def triplet_loss(output1, output2, output3, *, margin=MARGIN, eps=EPS,
                 block_rows=None):
    assert output1.shape == output2.shape == output3.shape
    assert output1.ndim == 2
    B, D = output1.shape

    if block_rows is None:
        tb = _choose_batch_tile(B, D, jnp.dtype(output1.dtype).itemsize)
    else:
        tb = _round_up(max(8, block_rows), 8)
    grid = (pl.cdiv(B, tb),)

    kernel = functools.partial(
        _triplet_loss_kernel, batch=B, margin=margin, eps=eps)

    # TODO(synk): for very small D (e.g. 32) a lane-dense repack of the
    # feature dim would cut VPU/DMA vreg counts 4x, but it requires a
    # segmented lane reduce; left as-is for clarity.
    out = pl.pallas_call(
        kernel,
        out_shape=jax.ShapeDtypeStruct((1, 1), jnp.float32),
        grid=grid,
        in_specs=[
            pl.BlockSpec((tb, D), lambda i: (i, 0)),
            pl.BlockSpec((tb, D), lambda i: (i, 0)),
            pl.BlockSpec((tb, D), lambda i: (i, 0)),
        ],
        out_specs=pl.BlockSpec(memory_space=pltpu.MemorySpace.SMEM),
        scratch_shapes=[pltpu.VMEM((tb, 1), jnp.float32)],
        compiler_params=pltpu.CompilerParams(
            dimension_semantics=("arbitrary",),  # reduction axis (accumulator)
        ),
    )(output1, output2, output3)
    return out[0, 0]


def _reference(o1, o2, o3, margin=MARGIN, eps=EPS):
    d_p = jnp.sqrt(jnp.sum((o1 - o2 + eps) ** 2, axis=-1, keepdims=True))
    d_n = jnp.sqrt(jnp.sum((o1 - o3 + eps) ** 2, axis=-1, keepdims=True))
    return jnp.mean(jnp.maximum(margin - d_n + d_p, 0.0))


if __name__ == "__main__":
    key = jax.random.PRNGKey(0)
    k1, k2, k3 = jax.random.split(key, 3)

    # Small shapes consistent with the module: batch=8, hidden=32.
    B, D = 8, 32
    output1 = jax.random.normal(k1, (B, D), dtype=jnp.float32)
    output2 = jax.random.normal(k2, (B, D), dtype=jnp.float32)
    output3 = jax.random.normal(k3, (B, D), dtype=jnp.float32)

    loss = triplet_loss(output1, output2, output3)
    jax.block_until_ready(loss)

    ref = _reference(output1, output2, output3)
    assert jnp.allclose(loss, ref, atol=1e-5, rtol=1e-5), (loss, ref)

    # Exercise the multi-tile + ragged-last-tile path (grid=3, B % TB != 0).
    B2, D2 = 20, 32
    p1 = jax.random.normal(k1, (B2, D2), dtype=jnp.float32)
    p2 = jax.random.normal(k2, (B2, D2), dtype=jnp.float32)
    p3 = jax.random.normal(k3, (B2, D2), dtype=jnp.float32)
    loss2 = triplet_loss(p1, p2, p3, block_rows=8)
    jax.block_until_ready(loss2)
    ref2 = _reference(p1, p2, p3)
    assert jnp.allclose(loss2, ref2, atol=1e-5, rtol=1e-5), (loss2, ref2)

    print("KERNEL_OK")
</pallas_src>

<mosaic_0001>
module attributes {stable_mosaic.version = 11 : i64} {
  func.func @_triplet_loss_kernel(%arg0: i32, %arg1: memref<8x32xf32, #tpu.memory_space<vmem>>, %arg2: memref<8x32xf32, #tpu.memory_space<vmem>>, %arg3: memref<8x32xf32, #tpu.memory_space<vmem>>, %arg4: memref<1x1xf32, #tpu.memory_space<smem>>, %arg5: memref<8x1xf32, #tpu.memory_space<vmem>>) attributes {dimension_semantics = [#tpu.dimension_semantics<arbitrary>], iteration_bounds = array<i64: 1>, scalar_prefetch = 0 : i64, scratch_operands = 1 : i64, tpu.core_type = #tpu.core_type<tc>, window_params = [{transform_indices = @transform_0, window_bounds = array<i64: 8, 32>}, {transform_indices = @transform_1, window_bounds = array<i64: 8, 32>}, {transform_indices = @transform_2, window_bounds = array<i64: 8, 32>}, {transform_indices = @transform_3, window_bounds = array<i64: 1, 1>}]} {
    %c0_i32 = arith.constant 0 : i32
    %0 = arith.cmpi eq, %arg0, %c0_i32 : i32
    %1 = arith.extui %0 : i1 to i32
    %c0_i32_0 = arith.constant 0 : i32
    %2 = arith.cmpi ne, %1, %c0_i32_0 : i32
    scf.if %2 {
      %cst_19 = arith.constant 0.000000e+00 : f32
      %39 = vector.broadcast %cst_19 : f32 to vector<8x1xf32>
      %c0_20 = arith.constant 0 : index
      %c0_21 = arith.constant 0 : index
      %40 = vector.load %arg5[%c0_20, %c0_21] : memref<8x1xf32, #tpu.memory_space<vmem>>, vector<8x1xf32>
      tpu.vector_store %arg5[%c0_20, %c0_21], %39 {strides = array<i32>} : memref<8x1xf32, #tpu.memory_space<vmem>>, vector<8x1xf32>,
    } else {
    }
    %c0 = arith.constant 0 : index
    %c0_1 = arith.constant 0 : index
    %3 = vector.load %arg1[%c0, %c0_1] : memref<8x32xf32, #tpu.memory_space<vmem>>, vector<8x32xf32>
    %c0_2 = arith.constant 0 : index
    %c0_3 = arith.constant 0 : index
    %4 = vector.load %arg2[%c0_2, %c0_3] : memref<8x32xf32, #tpu.memory_space<vmem>>, vector<8x32xf32>
    %c0_4 = arith.constant 0 : index
    %c0_5 = arith.constant 0 : index
    %5 = vector.load %arg3[%c0_4, %c0_5] : memref<8x32xf32, #tpu.memory_space<vmem>>, vector<8x32xf32>
    %6 = arith.subf %3, %4 : vector<8x32xf32>
    %cst = arith.constant 9.99999997E-7 : f32
    %7 = vector.broadcast %cst : f32 to vector<8x32xf32>
    %8 = arith.addf %6, %7 : vector<8x32xf32>
    %9 = arith.subf %3, %5 : vector<8x32xf32>
    %cst_6 = arith.constant 9.99999997E-7 : f32
    %10 = vector.broadcast %cst_6 : f32 to vector<8x32xf32>
    %11 = arith.addf %9, %10 : vector<8x32xf32>
    %12 = arith.mulf %8, %8 : vector<8x32xf32>
    %cst_7 = arith.constant dense<0.000000e+00> : vector<8xf32>
    %13 = vector.multi_reduction <add>, %12, %cst_7 [1] : vector<8x32xf32> to vector<8xf32>
    %14 = vector.shape_cast %13 : vector<8xf32> to vector<8x1xf32>
    %15 = math.sqrt %14 : vector<8x1xf32>
    %16 = arith.mulf %11, %11 : vector<8x32xf32>
    %cst_8 = arith.constant dense<0.000000e+00> : vector<8xf32>
    %17 = vector.multi_reduction <add>, %16, %cst_8 [1] : vector<8x32xf32> to vector<8xf32>
    %18 = vector.shape_cast %17 : vector<8xf32> to vector<8x1xf32>
    %19 = math.sqrt %18 : vector<8x1xf32>
    %cst_9 = arith.constant 2.000000e+00 : f32
    %20 = vector.broadcast %cst_9 : f32 to vector<8x1xf32>
    %21 = arith.subf %20, %19 : vector<8x1xf32>
    %22 = arith.addf %21, %15 : vector<8x1xf32>
    %cst_10 = arith.constant 0.000000e+00 : f32
    %23 = vector.broadcast %cst_10 : f32 to vector<8x1xf32>
    %24 = arith.maximumf %22, %23 : vector<8x1xf32>
    %25 = tpu.iota {dimensions = array<i32: 0>} : vector<8x1xi32>
    %c8_i32 = arith.constant 8 : i32
    %26 = arith.muli %arg0, %c8_i32 : i32
    %27 = vector.broadcast %26 : i32 to vector<8x1xi32>
    %28 = arith.addi %25, %27 : vector<8x1xi32>
    %c8_i32_11 = arith.constant 8 : i32
    %29 = vector.broadcast %c8_i32_11 : i32 to vector<8x1xi32>
    %30 = arith.cmpi slt, %28, %29 : vector<8x1xi32>
    %cst_12 = arith.constant 0.000000e+00 : f32
    %31 = vector.broadcast %cst_12 : f32 to vector<8x1xf32>
    %32 = arith.select %30, %24, %31 : vector<8x1xi1>, vector<8x1xf32>
    %c0_13 = arith.constant 0 : index
    %c0_14 = arith.constant 0 : index
    %33 = vector.load %arg5[%c0_13, %c0_14] : memref<8x1xf32, #tpu.memory_space<vmem>>, vector<8x1xf32>
    %34 = arith.addf %33, %32 : vector<8x1xf32>
    %c0_15 = arith.constant 0 : index
    %c0_16 = arith.constant 0 : index
    %35 = vector.load %arg5[%c0_15, %c0_16] : memref<8x1xf32, #tpu.memory_space<vmem>>, vector<8x1xf32>
    tpu.vector_store %arg5[%c0_15, %c0_16], %34 {strides = array<i32>} : memref<8x1xf32, #tpu.memory_space<vmem>>, vector<8x1xf32>,
    %c0_i32_17 = arith.constant 0 : i32
    %36 = arith.cmpi eq, %arg0, %c0_i32_17 : i32
    %37 = arith.extui %36 : i1 to i32
    %c0_i32_18 = arith.constant 0 : i32
    %38 = arith.cmpi ne, %37, %c0_i32_18 : i32
    scf.if %38 {
      %c0_19 = arith.constant 0 : index
      %c0_20 = arith.constant 0 : index
      %39 = vector.load %arg5[%c0_19, %c0_20] : memref<8x1xf32, #tpu.memory_space<vmem>>, vector<8x1xf32>
      %40 = vector.shape_cast %39 : vector<8x1xf32> to vector<1x8x1xf32>
      %cst_21 = arith.constant dense<0.000000e+00> : vector<1xf32>
      %41 = vector.multi_reduction <add>, %40, %cst_21 [1, 2] : vector<1x8x1xf32> to vector<1xf32>
      %42 = vector.shape_cast %41 : vector<1xf32> to vector<1x1x1xf32>
      %43 = vector.extract %42[0, 0, 0] : f32 from vector<1x1x1xf32>
      %cst_22 = arith.constant 8.000000e+00 : f32
      %44 = arith.divf %43, %cst_22 : f32
      %c0_23 = arith.constant 0 : index
      %c0_24 = arith.constant 0 : index
      %45 = memref.load %arg4[%c0_23, %c0_24] : memref<1x1xf32, #tpu.memory_space<smem>>
      memref.store %44, %arg4[%c0_23, %c0_24] : memref<1x1xf32, #tpu.memory_space<smem>>
    } else {
    }
    return
  }
  func.func @transform_0(%arg0: i32) -> (i32, i32) {
    %c0_i32 = arith.constant 0 : i32
    %c0_i32_0 = arith.constant 0 : i32
    return %arg0, %c0_i32 : i32, i32
  }
  func.func @transform_1(%arg0: i32) -> (i32, i32) {
    %c0_i32 = arith.constant 0 : i32
    %c0_i32_0 = arith.constant 0 : i32
    return %arg0, %c0_i32 : i32, i32
  }
  func.func @transform_2(%arg0: i32) -> (i32, i32) {
    %c0_i32 = arith.constant 0 : i32
    %c0_i32_0 = arith.constant 0 : i32
    return %arg0, %c0_i32 : i32, i32
  }
  func.func @transform_3(%arg0: i32) -> (i32, i32) {
    %c0_i32 = arith.constant 0 : i32
    %c0_i32_0 = arith.constant 0 : i32
    %c0_i32_1 = arith.constant 0 : i32
    return %c0_i32, %c0_i32_0 : i32, i32
  }
}

</mosaic_0001>

<bundles_post_ra>
// kernel: tpu_custom_call.1
= control target key start
LH: loop header
LB: loop body
LE: loop exit
PB: predicated region body
PF: predicated region fallthrough
CT: control target
= control target key end

     0   :  { %8 = vsyncpa [#allocation4], 0  ;;  %s303_s0 = inlined_call_operand.hbm [shape: f32[8,32], index: 0, kind: input, shape index: {}]   ;;  %s304_s1 = inlined_call_operand.hbm [shape: f32[8,32], index: 1, kind: input, shape index: {}]   ;;  %s305_s2 = inlined_call_operand.hbm [shape: f32[8,32], index: 2, kind: input, shape index: {}]   ;;  %s306_s3 = inlined_call_operand.hbm [shape: f32[1,1], index: 3, kind: output, shape index: {}]  }
   0x1   :  { %9 = vsyncpa [#allocation7], 0 }
   0x2   :  { %10 = vsyncpa [#allocation5], 0  ;;  %s227_s12 = smov [#allocation6]   ;;  %s228_s14 = smov [#allocation3]  }
   0x3   :  { %s27_s13 = sshll.u32 %s227_s12, 4  ;;  %s17_s15 = sshll.u32 %s228_s14, 4  ;;  %s28_s13 = int_to_ptr.vmem [resolvable:$true] %s27_s13  ;;  %s18_s15 = int_to_ptr.vmem [resolvable:$true] %s17_s15 }
   0x4   :  { %s145_s18 = scalar_lea.hbm %s304_s1, 128 }
   0x5   :  { %p146_p0 = scmp.ne.s32.totalorder %s304_s1, %s145_s18  ;;  %p149_p1 = scmp.lt.u32.totalorder %s145_s18, %s304_s1 }
   0x7   :  { %p151_p2 = pnand %p149_p1, %p146_p0 }
   0x9   :  { %154 = shalt.err (!%p151_p2)
}
   0xa   :  { %s155_s23 = scalar_lea.vmem %s28_s13, 128  ;;  %p160_p4 = scmp.lt.s32.totalorder %s28_s13, %s28_s13 }
   0xb   :  { %p156_p3 = scmp.ne.s32.totalorder %s28_s13, %s155_s23  ;;  %p161_p5 = scmp.lt.s32.totalorder %s155_s23, %s155_s23 }
   0xd   :  { %p162_p6 = por %p161_p5, %p160_p4 }
   0xf   :  { %p163_p7 = pnand %p162_p6, %p156_p3 }
  0x11   :  { %166 = shalt.err (!%p163_p7)
}
  0x12   :  { %30 = dma.hbm_to_vmem [thread:$0]  %s304_s1, 128, %s28_s13, [#allocation7]  }
  0x13   :  { %s167_s28 = scalar_lea.hbm %s303_s0, 128 }
  0x14   :  { %p168_p8 = scmp.ne.s32.totalorder %s303_s0, %s167_s28  ;;  %p171_p9 = scmp.lt.u32.totalorder %s167_s28, %s303_s0 }
  0x16   :  { %p173_p10 = pnand %p171_p9, %p168_p8 }
  0x18   :  { %176 = shalt.err (!%p173_p10)
}
  0x19   :  { %s177_s6 = scalar_lea.vmem %s18_s15, 128  ;;  %p182_p12 = scmp.lt.s32.totalorder %s18_s15, %s18_s15 }
  0x1a   :  { %p178_p11 = scmp.ne.s32.totalorder %s18_s15, %s177_s6  ;;  %p183_p13 = scmp.lt.s32.totalorder %s177_s6, %s177_s6 }
  0x1c   :  { %p184_p0 = por %p183_p13, %p182_p12 }
  0x1e   :  { %p185_p1 = pnand %p184_p0, %p178_p11 }
  0x20   :  { %188 = shalt.err (!%p185_p1)
}
  0x21   :  { %20 = dma.hbm_to_vmem [thread:$0]  %s303_s0, 128, %s18_s15, [#allocation4]  }
  0x22   :  { %s229_s8 = smov [#allocation8]   ;;  %s189_s12 = scalar_lea.hbm %s305_s2, 128 }
  0x23   :  { %s37_s9 = sshll.u32 %s229_s8, 4  ;;  %p190_p2 = scmp.ne.s32.totalorder %s305_s2, %s189_s12  ;;  %s38_s9 = int_to_ptr.vmem [resolvable:$true] %s37_s9 }
  0x24   :  { %p193_p3 = scmp.lt.u32.totalorder %s189_s12, %s305_s2 }
  0x26   :  { %p195_p4 = pnand %p193_p3, %p190_p2 }
  0x28   :  { %198 = shalt.err (!%p195_p4)
}
  0x29   :  { %s199_s18 = scalar_lea.vmem %s38_s9, 128  ;;  %p204_p6 = scmp.lt.s32.totalorder %s38_s9, %s38_s9 }
  0x2a   :  { %p200_p5 = scmp.ne.s32.totalorder %s38_s9, %s199_s18  ;;  %p205_p7 = scmp.lt.s32.totalorder %s199_s18, %s199_s18 }
  0x2c   :  { %p206_p8 = por %p205_p7, %p204_p6 }
  0x2e   :  { %p207_p9 = pnand %p206_p8, %p200_p5 }
  0x30   :  { %210 = shalt.err (!%p207_p9)
}
  0x31   :  { %40 = dma.hbm_to_vmem [thread:$0]  %s305_s2, 128, %s38_s9, [#allocation7]  }
  0x32   :  { %221 = dma.done.wait [#allocation4], 128  }
  0x33   :  { %222 = vsyncadd [#allocation4], 4294967168 }
  0x34   :  { %223 = dma.done.wait [#allocation7], 256  }
  0x35   :  { %224 = vsyncadd [#allocation7], 4294967040  ;;  %v56_v0 = vld [vmem:[#allocation3] sm:$0xff]  ;;  %v58_v1 = vld [vmem:[#allocation8] sm:$0xff]  ;;  %vm64_vm0 = vcmask 261120   ;;  %vm54_vm1 = vcmask 7168  }
  0x36   :  { %v57_v2 = vld [vmem:[#allocation6] sm:$0xff]  ;;  %v61_v3 = vsub.f32 %v56_v0, %v58_v1  ;;  %v230_v11 = vmov 0.0   ;;  %s211_s22 = scalar_lea.hbm %s306_s3, 16 }
  0x37   :  { %v59_v4 = vsub.f32 %v56_v0, %v57_v2  ;;  %55 = vst.msk [vmem:[#allocation2] sm:$0xff] %vm54_vm1, %v230_v11  ;;  %p212_p10 = scmp.ne.s32.totalorder %s306_s3, %s211_s22  ;;  %p215_p11 = scmp.lt.u32.totalorder %s211_s22, %s306_s3 }
  0x38   :  { %v62_v5 = vadd.f32 1e-06, %v61_v3 }
  0x39   :  { %v60_v6 = vadd.f32 1e-06, %v59_v4  ;;  %p217_p12 = pnand %p215_p11, %p212_p10 }
  0x3a   :  { %v75_v7 = vmul.f32 %v62_v5, %v62_v5 }
  0x3b   :  { %v63_v8 = vmul.f32 %v60_v6, %v60_v6 }
  0x3c   :  { %v76_v9 = vsel %vm64_vm0, %v75_v7, 0.0 }
  0x3d   :  { %77 = vadd.xlane.f32.xlu0 %v76_v9  ;;  %v65_v10 = vsel %vm64_vm0, %v63_v8, 0.0 }
  0x3e   :  { %v96_v26 = vld [vmem:[#allocation2] sm:$0xff] }
  0x41   :  { %66 = vadd.xlane.f32.xlu0 %v65_v10 }
  0xca   :  { %v78_v12 = vpop.xlane.xlu0 %77 }
  0xcb   :  { %141 = vrsqrt.f32 %v78_v12  ;;  %vm81_vm2 = vcmp.eq.f32.partialorder %v78_v12, inf  ;;  %v84_v16 = vand.u32 2147483648, %v78_v12  ;;  %vm83_vm3 = vcmp.eq.f32.partialorder %v78_v12, 0.0 }
  0xce   :  { %v67_v13 = vpop.xlane.xlu0 %66 }
  0xcf   :  { %143 = vrsqrt.f32 %v67_v13  ;;  %vm70_vm4 = vcmp.eq.f32.partialorder %v67_v13, inf  ;;  %v73_v21 = vand.u32 2147483648, %v67_v13  ;;  %vm72_vm5 = vcmp.eq.f32.partialorder %v67_v13, 0.0 }
  0xd5   :  { %v142_v14 = vpop.eup %141 }
  0xd6   :  { %v80_v15 = vmul.f32 %v142_v14, %v78_v12 }
  0xd8   :  { %v82_v17 = vsel %vm81_vm2, %v78_v12, %v80_v15 }
  0xd9   :  { %v144_v18 = vpop.eup %143  ;;  %v85_v19 = vsel %vm83_vm3, %v84_v16, %v82_v17 }
  0xda   :  { %v69_v20 = vmul.f32 %v144_v18, %v67_v13  ;;  %v86_v22 = vsub.f32 2.0, %v85_v19 }
  0xdc   :  { %v71_v23 = vsel %vm70_vm4, %v67_v13, %v69_v20 }
  0xdd   :  { %v74_v24 = vsel %vm72_vm5, %v73_v21, %v71_v23 }
  0xde   :  { %v87_v25 = vadd.f32 %v86_v22, %v74_v24 }
  0xe0   :  { %v88_v27 = vmax.f32 %v87_v25, 0.0 }
  0xe2   :  { %v97_v28 = vadd.f32 %v96_v26, %v88_v27 }
  0xe4   :  { %99 = vst.msk [vmem:[#allocation2] sm:$0xff] %vm54_vm1, %v97_v28 }
  0xeb   :  { %v103_v29 = vld [vmem:[#allocation2] sm:$0xff] }
  0xec   :  { %v104_v30 = vsel %vm54_vm1, %v103_v29, 0.0 }
  0xed   :  { %105 = vadd.xlane.f32.xlu1 %v104_v30 }
 0x17a   :  { %v106_v31 = vpop.xlane.xlu1 %105 }
 0x17b   :  { %v107_v32 = vrot.slane %v106_v31, 4 }
 0x17d   :  { %v108_v33 = vadd.f32 %v107_v32, %v106_v31 }
 0x17f   :  { %v109_v34 = vrot.slane %v108_v33, 2 }
 0x181   :  { %v110_v35 = vadd.f32 %v109_v34, %v108_v33 }
 0x183   :  { %v111_v36 = vrot.slane %v110_v35, 1 }
 0x185   :  { %v112_v37 = vadd.f32 %v111_v36, %v110_v35 }
 0x187   :  { %134 = vpush %v112_v37 }
 0x1b8   :  { %s135_s2 = spop %134 }
 0x1b9   :  { %s116_s19 = smul.f32 0.125, %s135_s2 }
 0x1bb   :  { %118 = sst [smem:[#allocation9]] %s116_s19 }
 0x1bc   :  { %220 = shalt.err (!%p217_p12)
}
 0x1bd   :  { %s231_s27 = smov [#allocation9]  }
 0x1be   :  { %126 = dma.smem_to_hbm %s231_s27, 16, %s306_s3, [#allocation5]  }
 0x1bf   :  { %225 = dma.done.wait [#allocation5], 16  }
 0x1c0   :  { %226 = vsyncadd [#allocation5], 4294967280 }
 0x1c1   :  { %130 = sfence }
 0x1c2   :  { %131 = vsyncpa [#allocation4], 1 }
 0x1c3   :  { %132 = vsyncpa [#allocation7], 1 }
 0x1c4   :  { %133 = vsyncpa [#allocation5], 1 }

</bundles_post_ra>
